<compile_context>
chip_gen: v5e
topology: v5e:2x2
jax: 0.10.0
libtpu: 0.0.40
codegen_flags: <defaults>
</compile_context>

<pallas_src>
import functools

import jax
import jax.numpy as jnp
import numpy as np
from jax import lax
from jax.experimental import pallas as pl
from jax.experimental.pallas import tpu as pltpu


# ----------------------------------------------------------------------------
# Fused kernel: 3x3 conv (via 9 shifted VMEM slices) against 4 rotated weight
# variants, 4-way branch max, bias, ReLU -- all in one pass.
# ----------------------------------------------------------------------------
def _fused_rot_conv_kernel(xp_ref, w_ref, b_ref, o_ref, *, TH, W, Cin, Cout):
    # xp_ref: (1, H+2, W+2, Cin)   zero-padded NHWC image (resident per batch)
    # w_ref : (9, Cin, 4*Cout)     tap-major weights, 4 rotated branches on N
    # b_ref : (1, Cout)
    # o_ref : (1, TH*W, Cout)      one row-tile of the output
    m = pl.program_id(1)                       # row-tile index

    acc = jnp.zeros((TH * W, 4 * Cout), jnp.float32)
    for dy in range(3):
        for dx in range(3):
            # Halo slice of the padded image for this tap: (TH, W, Cin).
            patch = xp_ref[0, pl.ds(m * TH + dy, TH), pl.ds(dx, W), :]
            # Collapse (TH, W) into the sublane axis (lane dim Cin unchanged).
            patch2d = patch.reshape(TH * W, Cin)
            # One matmul feeds all 4 rotation branches (wider N on the MXU).
            acc += jnp.dot(patch2d, w_ref[dy * 3 + dx],
                           preferred_element_type=jnp.float32)

    # 4-way branch max (static lane slices), then shared bias + ReLU.
    r = jnp.maximum(
        jnp.maximum(acc[:, 0:Cout], acc[:, Cout:2 * Cout]),
        jnp.maximum(acc[:, 2 * Cout:3 * Cout], acc[:, 3 * Cout:4 * Cout]))
    o_ref[0] = jnp.maximum(r + b_ref[...], 0.0).astype(o_ref.dtype)


# ----------------------------------------------------------------------------
# RotationWrapperModel.forward (generic "else" branch)
# ----------------------------------------------------------------------------
def rotation_wrapper_forward(x_nchw, weight, bias, *, tile_h=8):
    """x_nchw: (N, Cin, H, W) f32;  weight: (Cout, Cin, 3, 3);  bias: (Cout,)."""
    N, Cin, H, W = x_nchw.shape
    Cout = weight.shape[0]
    assert H == W, "90-degree rotation ensemble requires a square image"
    assert H % tile_h == 0, "tile_h must divide H"

    # NCHW -> NHWC, zero same-padding (no 9x im2col materialization in HBM).
    x_nhwc = jnp.transpose(x_nchw, (0, 2, 3, 1))
    xp = jnp.pad(x_nhwc, ((0, 0), (1, 1), (1, 1), (0, 0)))

    # The 4 rotated kernels, concatenated along the output-channel axis:
    # w_cat[dy, dx, ci, k*Cout + co] = rot90^k(weight)[co, ci, dy, dx].
    w_rots = [jnp.rot90(weight, k=k, axes=(2, 3)) for k in range(4)]
    w_cat = jnp.concatenate(
        [jnp.transpose(wk, (2, 3, 1, 0)) for wk in w_rots], axis=-1)
    w_cat = w_cat.reshape(9, Cin, 4 * Cout)
    b_row = bias.reshape(1, Cout)

    grid = (N, H // tile_h)
    kernel = functools.partial(_fused_rot_conv_kernel,
                               TH=tile_h, W=W, Cin=Cin, Cout=Cout)

    flops = 2 * N * H * W * 9 * Cin * (4 * Cout)
    bytes_accessed = 4 * (xp.size + w_cat.size + b_row.size + N * H * W * Cout)

    out = pl.pallas_call(
        kernel,
        out_shape=jax.ShapeDtypeStruct((N, H * W, Cout), x_nchw.dtype),
        grid_spec=pltpu.PrefetchScalarGridSpec(
            num_scalar_prefetch=0,
            grid=grid,
            in_specs=[
                # Padded image stays resident across the row-tile axis.
                pl.BlockSpec((1, H + 2, W + 2, Cin), lambda n, m: (n, 0, 0, 0)),
                pl.BlockSpec((9, Cin, 4 * Cout), lambda n, m: (0, 0, 0)),
                pl.BlockSpec((1, Cout), lambda n, m: (0, 0)),
            ],
            out_specs=pl.BlockSpec((1, tile_h * W, Cout),
                                   lambda n, m: (n, m, 0)),
        ),
        compiler_params=pltpu.CompilerParams(
            dimension_semantics=("parallel", "parallel"),
            vmem_limit_bytes=32 * 1024 * 1024,
        ),
        cost_estimate=pl.CostEstimate(flops=flops, transcendentals=0,
                                      bytes_accessed=bytes_accessed),
    )(xp, w_cat, b_row)

    out = out.reshape(N, H, W, Cout)
    return jnp.transpose(out, (0, 3, 1, 2))   # NHWC -> NCHW

    # TODO(synk): UNetBranched / DeepLabV3 branches and plot_mid_data are not
    # translated (no base models / matplotlib in scope).


# ----------------------------------------------------------------------------
# Pure-JAX reference of the ORIGINAL 4-branch formulation (validates the
# rotated-weight fusion, per the review's correctness concern).
# ----------------------------------------------------------------------------
def _reference_forward(x, weight, bias):
    def base(t):
        y = lax.conv_general_dilated(
            t, weight, window_strides=(1, 1), padding="SAME",
            dimension_numbers=("NCHW", "OIHW", "NCHW"))
        return jax.nn.relu(y + bias[None, :, None, None])

    rot = lambda t: jnp.rot90(t, k=1, axes=(2, 3))
    p0 = base(x)
    x90 = rot(x);    p90 = base(x90)
    x180 = rot(x90); p180 = base(x180)
    x270 = rot(x180); p270 = base(x270)
    p90 = rot(rot(rot(p90)))
    p180 = rot(rot(p180))
    p270 = rot(p270)
    return jnp.max(jnp.stack([p0, p90, p180, p270]), axis=0)


if __name__ == "__main__":
    key = jax.random.PRNGKey(0)
    kx, kw, kb = jax.random.split(key, 3)

    N, C, H, W = 2, 4, 16, 16
    x = jax.random.normal(kx, (N, C, H, W), dtype=jnp.float32)
    weight = jax.random.normal(kw, (C, C, 3, 3), dtype=jnp.float32) * 0.1
    bias = jax.random.normal(kb, (C,), dtype=jnp.float32) * 0.1

    fwd = jax.jit(rotation_wrapper_forward)
    pred = fwd(x, weight, bias)
    jax.block_until_ready(pred)
    assert pred.shape == (N, C, H, W), pred.shape

    ref = _reference_forward(x, weight, bias)
    np.testing.assert_allclose(np.asarray(pred), np.asarray(ref),
                               rtol=5e-2, atol=5e-2)
    print("KERNEL_OK")
</pallas_src>

<mosaic_0001>
module attributes {stable_mosaic.version = 11 : i64} {
  func.func @_fused_rot_conv_kernel(%arg0: i32, %arg1: i32, %arg2: memref<1x18x18x4xf32, #tpu.memory_space<vmem>>, %arg3: memref<9x4x16xf32, #tpu.memory_space<vmem>>, %arg4: memref<1x4xf32, #tpu.memory_space<vmem>>, %arg5: memref<1x128x4xf32, #tpu.memory_space<vmem>>) attributes {dimension_semantics = [#tpu.dimension_semantics<parallel>, #tpu.dimension_semantics<parallel>], iteration_bounds = array<i64: 2, 2>, scalar_prefetch = 0 : i64, scratch_operands = 0 : i64, tpu.core_type = #tpu.core_type<tc>, window_params = [{transform_indices = @transform_0, window_bounds = array<i64: 1, 18, 18, 4>}, {pipeline_mode = #tpu.pipeline_mode<synchronous>, transform_indices = @transform_1, window_bounds = array<i64: 9, 4, 16>}, {pipeline_mode = #tpu.pipeline_mode<synchronous>, transform_indices = @transform_2, window_bounds = array<i64: 1, 4>}, {transform_indices = @transform_3, window_bounds = array<i64: 1, 128, 4>}]} {
    %cst = arith.constant 0.000000e+00 : f32
    %0 = vector.broadcast %cst : f32 to vector<128x16xf32>
    %c8_i32 = arith.constant 8 : i32
    %1 = arith.muli %arg1, %c8_i32 : i32
    %c0_i32 = arith.constant 0 : i32
    %2 = arith.addi %1, %c0_i32 : i32
    %c0 = arith.constant 0 : index
    %3 = arith.index_cast %2 : i32 to index
    %c0_0 = arith.constant 0 : index
    %c0_1 = arith.constant 0 : index
    %4 = vector.load %arg2[%c0, %3, %c0_0, %c0_1] : memref<1x18x18x4xf32, #tpu.memory_space<vmem>>, vector<1x8x16x4xf32>
    %5 = vector.shape_cast %4 : vector<1x8x16x4xf32> to vector<8x16x4xf32>
    %6 = vector.shape_cast %5 : vector<8x16x4xf32> to vector<128x4xf32>
    %c0_2 = arith.constant 0 : index
    %c0_3 = arith.constant 0 : index
    %c0_4 = arith.constant 0 : index
    %7 = vector.load %arg3[%c0_2, %c0_3, %c0_4] : memref<9x4x16xf32, #tpu.memory_space<vmem>>, vector<1x4x16xf32>
    %8 = vector.shape_cast %7 : vector<1x4x16xf32> to vector<4x16xf32>
    %cst_5 = arith.constant dense<0.000000e+00> : vector<128x16xf32>
    %9 = tpu.matmul %6, %8, %cst_5 {dimension_numbers = #tpu.dot_dimension_numbers<[1], [0], [0], [1], [0, 0, 1, 1], [], []>} : vector<128x4xf32>, vector<4x16xf32>, vector<128x16xf32> -> vector<128x16xf32>
    %10 = arith.addf %0, %9 : vector<128x16xf32>
    %c8_i32_6 = arith.constant 8 : i32
    %11 = arith.muli %arg1, %c8_i32_6 : i32
    %c0_i32_7 = arith.constant 0 : i32
    %12 = arith.addi %11, %c0_i32_7 : i32
    %c0_8 = arith.constant 0 : index
    %13 = arith.index_cast %12 : i32 to index
    %c1 = arith.constant 1 : index
    %c0_9 = arith.constant 0 : index
    %14 = vector.load %arg2[%c0_8, %13, %c1, %c0_9] : memref<1x18x18x4xf32, #tpu.memory_space<vmem>>, vector<1x8x16x4xf32>
    %15 = vector.shape_cast %14 : vector<1x8x16x4xf32> to vector<8x16x4xf32>
    %16 = vector.shape_cast %15 : vector<8x16x4xf32> to vector<128x4xf32>
    %c1_10 = arith.constant 1 : index
    %c0_11 = arith.constant 0 : index
    %c0_12 = arith.constant 0 : index
    %17 = vector.load %arg3[%c1_10, %c0_11, %c0_12] : memref<9x4x16xf32, #tpu.memory_space<vmem>>, vector<1x4x16xf32>
    %18 = vector.shape_cast %17 : vector<1x4x16xf32> to vector<4x16xf32>
    %cst_13 = arith.constant dense<0.000000e+00> : vector<128x16xf32>
    %19 = tpu.matmul %16, %18, %cst_13 {dimension_numbers = #tpu.dot_dimension_numbers<[1], [0], [0], [1], [0, 0, 1, 1], [], []>} : vector<128x4xf32>, vector<4x16xf32>, vector<128x16xf32> -> vector<128x16xf32>
    %20 = arith.addf %10, %19 : vector<128x16xf32>
    %c8_i32_14 = arith.constant 8 : i32
    %21 = arith.muli %arg1, %c8_i32_14 : i32
    %c0_i32_15 = arith.constant 0 : i32
    %22 = arith.addi %21, %c0_i32_15 : i32
    %c0_16 = arith.constant 0 : index
    %23 = arith.index_cast %22 : i32 to index
    %c2 = arith.constant 2 : index
    %c0_17 = arith.constant 0 : index
    %24 = vector.load %arg2[%c0_16, %23, %c2, %c0_17] : memref<1x18x18x4xf32, #tpu.memory_space<vmem>>, vector<1x8x16x4xf32>
    %25 = vector.shape_cast %24 : vector<1x8x16x4xf32> to vector<8x16x4xf32>
    %26 = vector.shape_cast %25 : vector<8x16x4xf32> to vector<128x4xf32>
    %c2_18 = arith.constant 2 : index
    %c0_19 = arith.constant 0 : index
    %c0_20 = arith.constant 0 : index
    %27 = vector.load %arg3[%c2_18, %c0_19, %c0_20] : memref<9x4x16xf32, #tpu.memory_space<vmem>>, vector<1x4x16xf32>
    %28 = vector.shape_cast %27 : vector<1x4x16xf32> to vector<4x16xf32>
    %cst_21 = arith.constant dense<0.000000e+00> : vector<128x16xf32>
    %29 = tpu.matmul %26, %28, %cst_21 {dimension_numbers = #tpu.dot_dimension_numbers<[1], [0], [0], [1], [0, 0, 1, 1], [], []>} : vector<128x4xf32>, vector<4x16xf32>, vector<128x16xf32> -> vector<128x16xf32>
    %30 = arith.addf %20, %29 : vector<128x16xf32>
    %c8_i32_22 = arith.constant 8 : i32
    %31 = arith.muli %arg1, %c8_i32_22 : i32
    %c1_i32 = arith.constant 1 : i32
    %32 = arith.addi %31, %c1_i32 : i32
    %c0_23 = arith.constant 0 : index
    %33 = arith.index_cast %32 : i32 to index
    %c0_24 = arith.constant 0 : index
    %c0_25 = arith.constant 0 : index
    %34 = vector.load %arg2[%c0_23, %33, %c0_24, %c0_25] : memref<1x18x18x4xf32, #tpu.memory_space<vmem>>, vector<1x8x16x4xf32>
    %35 = vector.shape_cast %34 : vector<1x8x16x4xf32> to vector<8x16x4xf32>
    %36 = vector.shape_cast %35 : vector<8x16x4xf32> to vector<128x4xf32>
    %c3 = arith.constant 3 : index
    %c0_26 = arith.constant 0 : index
    %c0_27 = arith.constant 0 : index
    %37 = vector.load %arg3[%c3, %c0_26, %c0_27] : memref<9x4x16xf32, #tpu.memory_space<vmem>>, vector<1x4x16xf32>
    %38 = vector.shape_cast %37 : vector<1x4x16xf32> to vector<4x16xf32>
    %cst_28 = arith.constant dense<0.000000e+00> : vector<128x16xf32>
    %39 = tpu.matmul %36, %38, %cst_28 {dimension_numbers = #tpu.dot_dimension_numbers<[1], [0], [0], [1], [0, 0, 1, 1], [], []>} : vector<128x4xf32>, vector<4x16xf32>, vector<128x16xf32> -> vector<128x16xf32>
    %40 = arith.addf %30, %39 : vector<128x16xf32>
    %c8_i32_29 = arith.constant 8 : i32
    %41 = arith.muli %arg1, %c8_i32_29 : i32
    %c1_i32_30 = arith.constant 1 : i32
    %42 = arith.addi %41, %c1_i32_30 : i32
    %c0_31 = arith.constant 0 : index
    %43 = arith.index_cast %42 : i32 to index
    %c1_32 = arith.constant 1 : index
    %c0_33 = arith.constant 0 : index
    %44 = vector.load %arg2[%c0_31, %43, %c1_32, %c0_33] : memref<1x18x18x4xf32, #tpu.memory_space<vmem>>, vector<1x8x16x4xf32>
    %45 = vector.shape_cast %44 : vector<1x8x16x4xf32> to vector<8x16x4xf32>
    %46 = vector.shape_cast %45 : vector<8x16x4xf32> to vector<128x4xf32>
    %c4 = arith.constant 4 : index
    %c0_34 = arith.constant 0 : index
    %c0_35 = arith.constant 0 : index
    %47 = vector.load %arg3[%c4, %c0_34, %c0_35] : memref<9x4x16xf32, #tpu.memory_space<vmem>>, vector<1x4x16xf32>
    %48 = vector.shape_cast %47 : vector<1x4x16xf32> to vector<4x16xf32>
    %cst_36 = arith.constant dense<0.000000e+00> : vector<128x16xf32>
    %49 = tpu.matmul %46, %48, %cst_36 {dimension_numbers = #tpu.dot_dimension_numbers<[1], [0], [0], [1], [0, 0, 1, 1], [], []>} : vector<128x4xf32>, vector<4x16xf32>, vector<128x16xf32> -> vector<128x16xf32>
    %50 = arith.addf %40, %49 : vector<128x16xf32>
    %c8_i32_37 = arith.constant 8 : i32
    %51 = arith.muli %arg1, %c8_i32_37 : i32
    %c1_i32_38 = arith.constant 1 : i32
    %52 = arith.addi %51, %c1_i32_38 : i32
    %c0_39 = arith.constant 0 : index
    %53 = arith.index_cast %52 : i32 to index
    %c2_40 = arith.constant 2 : index
    %c0_41 = arith.constant 0 : index
    %54 = vector.load %arg2[%c0_39, %53, %c2_40, %c0_41] : memref<1x18x18x4xf32, #tpu.memory_space<vmem>>, vector<1x8x16x4xf32>
    %55 = vector.shape_cast %54 : vector<1x8x16x4xf32> to vector<8x16x4xf32>
    %56 = vector.shape_cast %55 : vector<8x16x4xf32> to vector<128x4xf32>
    %c5 = arith.constant 5 : index
    %c0_42 = arith.constant 0 : index
    %c0_43 = arith.constant 0 : index
    %57 = vector.load %arg3[%c5, %c0_42, %c0_43] : memref<9x4x16xf32, #tpu.memory_space<vmem>>, vector<1x4x16xf32>
    %58 = vector.shape_cast %57 : vector<1x4x16xf32> to vector<4x16xf32>
    %cst_44 = arith.constant dense<0.000000e+00> : vector<128x16xf32>
    %59 = tpu.matmul %56, %58, %cst_44 {dimension_numbers = #tpu.dot_dimension_numbers<[1], [0], [0], [1], [0, 0, 1, 1], [], []>} : vector<128x4xf32>, vector<4x16xf32>, vector<128x16xf32> -> vector<128x16xf32>
    %60 = arith.addf %50, %59 : vector<128x16xf32>
    %c8_i32_45 = arith.constant 8 : i32
    %61 = arith.muli %arg1, %c8_i32_45 : i32
    %c2_i32 = arith.constant 2 : i32
    %62 = arith.addi %61, %c2_i32 : i32
    %c0_46 = arith.constant 0 : index
    %63 = arith.index_cast %62 : i32 to index
    %c0_47 = arith.constant 0 : index
    %c0_48 = arith.constant 0 : index
    %64 = vector.load %arg2[%c0_46, %63, %c0_47, %c0_48] : memref<1x18x18x4xf32, #tpu.memory_space<vmem>>, vector<1x8x16x4xf32>
    %65 = vector.shape_cast %64 : vector<1x8x16x4xf32> to vector<8x16x4xf32>
    %66 = vector.shape_cast %65 : vector<8x16x4xf32> to vector<128x4xf32>
    %c6 = arith.constant 6 : index
    %c0_49 = arith.constant 0 : index
    %c0_50 = arith.constant 0 : index
    %67 = vector.load %arg3[%c6, %c0_49, %c0_50] : memref<9x4x16xf32, #tpu.memory_space<vmem>>, vector<1x4x16xf32>
    %68 = vector.shape_cast %67 : vector<1x4x16xf32> to vector<4x16xf32>
    %cst_51 = arith.constant dense<0.000000e+00> : vector<128x16xf32>
    %69 = tpu.matmul %66, %68, %cst_51 {dimension_numbers = #tpu.dot_dimension_numbers<[1], [0], [0], [1], [0, 0, 1, 1], [], []>} : vector<128x4xf32>, vector<4x16xf32>, vector<128x16xf32> -> vector<128x16xf32>
    %70 = arith.addf %60, %69 : vector<128x16xf32>
    %c8_i32_52 = arith.constant 8 : i32
    %71 = arith.muli %arg1, %c8_i32_52 : i32
    %c2_i32_53 = arith.constant 2 : i32
    %72 = arith.addi %71, %c2_i32_53 : i32
    %c0_54 = arith.constant 0 : index
    %73 = arith.index_cast %72 : i32 to index
    %c1_55 = arith.constant 1 : index
    %c0_56 = arith.constant 0 : index
    %74 = vector.load %arg2[%c0_54, %73, %c1_55, %c0_56] : memref<1x18x18x4xf32, #tpu.memory_space<vmem>>, vector<1x8x16x4xf32>
    %75 = vector.shape_cast %74 : vector<1x8x16x4xf32> to vector<8x16x4xf32>
    %76 = vector.shape_cast %75 : vector<8x16x4xf32> to vector<128x4xf32>
    %c7 = arith.constant 7 : index
    %c0_57 = arith.constant 0 : index
    %c0_58 = arith.constant 0 : index
    %77 = vector.load %arg3[%c7, %c0_57, %c0_58] : memref<9x4x16xf32, #tpu.memory_space<vmem>>, vector<1x4x16xf32>
    %78 = vector.shape_cast %77 : vector<1x4x16xf32> to vector<4x16xf32>
    %cst_59 = arith.constant dense<0.000000e+00> : vector<128x16xf32>
    %79 = tpu.matmul %76, %78, %cst_59 {dimension_numbers = #tpu.dot_dimension_numbers<[1], [0], [0], [1], [0, 0, 1, 1], [], []>} : vector<128x4xf32>, vector<4x16xf32>, vector<128x16xf32> -> vector<128x16xf32>
    %80 = arith.addf %70, %79 : vector<128x16xf32>
    %c8_i32_60 = arith.constant 8 : i32
    %81 = arith.muli %arg1, %c8_i32_60 : i32
    %c2_i32_61 = arith.constant 2 : i32
    %82 = arith.addi %81, %c2_i32_61 : i32
    %c0_62 = arith.constant 0 : index
    %83 = arith.index_cast %82 : i32 to index
    %c2_63 = arith.constant 2 : index
    %c0_64 = arith.constant 0 : index
    %84 = vector.load %arg2[%c0_62, %83, %c2_63, %c0_64] : memref<1x18x18x4xf32, #tpu.memory_space<vmem>>, vector<1x8x16x4xf32>
    %85 = vector.shape_cast %84 : vector<1x8x16x4xf32> to vector<8x16x4xf32>
    %86 = vector.shape_cast %85 : vector<8x16x4xf32> to vector<128x4xf32>
    %c8 = arith.constant 8 : index
    %c0_65 = arith.constant 0 : index
    %c0_66 = arith.constant 0 : index
    %87 = vector.load %arg3[%c8, %c0_65, %c0_66] : memref<9x4x16xf32, #tpu.memory_space<vmem>>, vector<1x4x16xf32>
    %88 = vector.shape_cast %87 : vector<1x4x16xf32> to vector<4x16xf32>
    %cst_67 = arith.constant dense<0.000000e+00> : vector<128x16xf32>
    %89 = tpu.matmul %86, %88, %cst_67 {dimension_numbers = #tpu.dot_dimension_numbers<[1], [0], [0], [1], [0, 0, 1, 1], [], []>} : vector<128x4xf32>, vector<4x16xf32>, vector<128x16xf32> -> vector<128x16xf32>
    %90 = arith.addf %80, %89 : vector<128x16xf32>
    %91 = vector.extract_strided_slice %90 {offsets = [0, 0], sizes = [128, 4], strides = [1, 1]} : vector<128x16xf32> to vector<128x4xf32>
    %92 = vector.extract_strided_slice %90 {offsets = [0, 4], sizes = [128, 4], strides = [1, 1]} : vector<128x16xf32> to vector<128x4xf32>
    %93 = arith.maximumf %91, %92 : vector<128x4xf32>
    %94 = vector.extract_strided_slice %90 {offsets = [0, 8], sizes = [128, 4], strides = [1, 1]} : vector<128x16xf32> to vector<128x4xf32>
    %95 = vector.extract_strided_slice %90 {offsets = [0, 12], sizes = [128, 4], strides = [1, 1]} : vector<128x16xf32> to vector<128x4xf32>
    %96 = arith.maximumf %94, %95 : vector<128x4xf32>
    %97 = arith.maximumf %93, %96 : vector<128x4xf32>
    %c0_68 = arith.constant 0 : index
    %c0_69 = arith.constant 0 : index
    %98 = vector.load %arg4[%c0_68, %c0_69] : memref<1x4xf32, #tpu.memory_space<vmem>>, vector<1x4xf32>
    %99 = vector.broadcast %98 : vector<1x4xf32> to vector<128x4xf32>
    %100 = arith.addf %97, %99 : vector<128x4xf32>
    %cst_70 = arith.constant 0.000000e+00 : f32
    %101 = vector.broadcast %cst_70 : f32 to vector<128x4xf32>
    %102 = arith.maximumf %100, %101 : vector<128x4xf32>
    %c0_71 = arith.constant 0 : index
    %c0_72 = arith.constant 0 : index
    %c0_73 = arith.constant 0 : index
    %103 = vector.load %arg5[%c0_71, %c0_72, %c0_73] : memref<1x128x4xf32, #tpu.memory_space<vmem>>, vector<1x128x4xf32>
    %104 = vector.shape_cast %103 : vector<1x128x4xf32> to vector<128x4xf32>
    %105 = vector.shape_cast %102 : vector<128x4xf32> to vector<1x128x4xf32>
    tpu.vector_store %arg5[%c0_71, %c0_72, %c0_73], %105 {strides = array<i32>} : memref<1x128x4xf32, #tpu.memory_space<vmem>>, vector<1x128x4xf32>,
    return
  }
  func.func @transform_0(%arg0: i32, %arg1: i32) -> (i32, i32, i32, i32) {
    %c0_i32 = arith.constant 0 : i32
    %c0_i32_0 = arith.constant 0 : i32
    %c0_i32_1 = arith.constant 0 : i32
    %c0_i32_2 = arith.constant 0 : i32
    return %arg0, %c0_i32, %c0_i32_0, %c0_i32_1 : i32, i32, i32, i32
  }
  func.func @transform_1(%arg0: i32, %arg1: i32) -> (i32, i32, i32) {
    %c0_i32 = arith.constant 0 : i32
    %c0_i32_0 = arith.constant 0 : i32
    %c0_i32_1 = arith.constant 0 : i32
    %c0_i32_2 = arith.constant 0 : i32
    return %c0_i32, %c0_i32_0, %c0_i32_1 : i32, i32, i32
  }
  func.func @transform_2(%arg0: i32, %arg1: i32) -> (i32, i32) {
    %c0_i32 = arith.constant 0 : i32
    %c0_i32_0 = arith.constant 0 : i32
    %c0_i32_1 = arith.constant 0 : i32
    return %c0_i32, %c0_i32_0 : i32, i32
  }
  func.func @transform_3(%arg0: i32, %arg1: i32) -> (i32, i32, i32) {
    %c0_i32 = arith.constant 0 : i32
    %c0_i32_0 = arith.constant 0 : i32
    return %arg0, %arg1, %c0_i32 : i32, i32, i32
  }
}

</mosaic_0001>

<bundles_post_ra>
// kernel: rotation_wrapper_forward.1
= control target key start
LH: loop header
LB: loop body
LE: loop exit
PB: predicated region body
PF: predicated region fallthrough
CT: control target
= control target key end

     0   :  { %s2211_s12 = smov 0   ;;  %s2213_s13 = smov 0   ;;  %s3006_s0 = inlined_call_operand.vmem [shape: f32[2,18,18,4], index: 0, kind: input, shape index: {}]   ;;  %s3007_s1 = inlined_call_operand.vmem [shape: f32[9,4,16], index: 1, kind: input, shape index: {}]   ;;  %s3008_s2 = inlined_call_operand.vmem [shape: f32[1,4], index: 2, kind: input, shape index: {}]   ;;  %s3009_s3 = inlined_call_operand.vmem [shape: f32[2,256,4], index: 3, kind: output, shape index: {}]  }
   0x1   :  { %s2215_s14 = smov 0   ;;  %s2217_s15 = smov 0  }
   0x2   :  { %s2219_s16 = smov 0  }
   0x3 LB: > { %s22_s17 = sadd.s32 1, %s2179_s14  ;;  %s25_s18 = sadd.s32 1, %s2183_s15  ;;  %s2187_s16 = sphi %s2219_s16, %s13_s16   ;;  %s2183_s15 = sphi %s2217_s15, %s3022_s15   ;;  %s2179_s14 = sphi %s2215_s14, %s3021_s14   ;;  %s2175_s13 = sphi %s2213_s13, %s3020_s13   ;;  %s2171_s12 = sphi %s2211_s12, %s3019_s12  }
   0x4   : > { %p23_p0 = scmp.ge.s32.totalorder %s22_s17, 2  ;;  %p1832_p1 = scmp.ge.s32.totalorder %s2187_s16, 1 }
   0x5   : > { %p151_p2 = scmp.lt.s32.totalorder %s2187_s16, 5 }
   0x6   : > { %s3024_s17 = smov (%p23_p0, %s22_s17), 0  ;;  %s3026_s18 = smov (!%p23_p0, %s25_s18), %s2183_s15 }
   0x7   : > { %p152_p3 = pnand %p1832_p1, %p151_p2  ;;  %p27_p4 = scmp.ge.s32.totalorder %s3026_s18, 2 }
   0x9   : > { %s3028_s18 = smov (%p27_p4, %s3026_s18), 0  ;;  %155 = sbr.rel (%p152_p3) target bundleno = 679 (0x2a7), region = 32 }
   0xe   : > { %v1839_v0 = vld [vmem:[%s3007_s1 + $0x4] sm:$0xf]  ;;  %vm281_vm0 = vcmask 1043456   ;;  %p179_p5 = scmp.lt.s32.totalorder %s2175_s13, 1  ;;  %v1874_v1 = vld [vmem:[%s3007_s1 + $0x8] sm:$0xf] }
   0xf   : > { %2102 = vmatpush.msk.msra.mxu1 %vm281_vm0, %v1839_v0  ;;  %2103 = vmatpush.msk.msra.mxu2 %vm281_vm0, %v1839_v0  ;;  %v1910_v2 = vld [vmem:[%s3007_s1 + $0xc] sm:$0xf]  ;;  %v213_v3 = vld [vmem:[%s3007_s1] sm:$0xf]  ;;  %v1944_v4 = vld [vmem:[%s3007_s1 + $0x10] sm:$0xf] }
  0x10   : > { %s3030_s13 = smov (!%p179_p5, %s2175_s13), 1  ;;  %2104 = vmatpush.msk.msra.mxu3 %vm281_vm0, %v1839_v0  ;;  %s1838_s29 = smul.u32 192, %s2171_s12  ;;  %1840 = vmatpush.msk.msra.mxu0 %vm281_vm0, %v1839_v0  ;;  %vm232_vm1 = vcmask 31744   ;;  %v2014_v9 = vld [vmem:[%s3007_s1 + $0x18] sm:$0xf] }
  0x11   : > { %1875 = vmatpush.msk.msrb.mxu2 %vm281_vm0, %v1874_v1  ;;  %1857 = vmatpush.msk.msrb.mxu1 %vm281_vm0, %v213_v3  ;;  %s2105_s30 = smul.u32 432, %s3030_s13  ;;  %v2048_v12 = vld [vmem:[%s3007_s1 + $0x1c] sm:$0xf]  ;;  %v1978_v15 = vld [vmem:[%s3007_s1 + $0x14] sm:$0xf]  ;;  %s2189_s23 = smov 124  }
  0x12   : > { %1911 = vmatpush.msk.msrb.mxu3 %vm281_vm0, %v1910_v2  ;;  %1945 = vmatpush.msk.msrb.mxu0 %vm281_vm0, %v1944_v4  ;;  %v2082_v16 = vld [vmem:[%s3007_s1 + $0x20] sm:$0xf]  ;;  %s2190_s24 = smov 120   ;;  %s1834_s25 = sshll.u32 %s2171_s12, 4 }
  0x13   : > { %s183_s6 = scalar_lea.vmem %s3006_s0, %s2105_s30  ;;  %p187_p6 = scmp.lt.s32.totalorder %s1834_s25, 31 }
  0x14   : > { %s2273_s7 = scalar_lea.vmem %s183_s6, %s1838_s29  ;;  %s1835_s26 = sshll.u32 %s3030_s13, 5 }
  0x15   : > { %v2276_v5 = vld [vmem:[%s2273_s7 + $0x31] sm:$0xff]  ;;  %v2279_v6 = vld [vmem:[%s2273_s7 + $0x61] sm:$0xff]  ;;  %v2296_v10 = vld [vmem:[%s2273_s7 + $0x39] sm:$0xff]  ;;  %s3032_s25 = smov (!%p187_p6, %s1834_s25), 31 }
  0x16   : > { %v2282_v7 = vld [vmem:[%s2273_s7 + $0x91] sm:$0xff]  ;;  %1845 = vmatmul.msk.f32.vlgmr.msra.gmra.mxu1 %vm232_vm1, %v2276_v5  ;;  %1849 = vmatmul.msk.f32.vlgmr.msra.gmra.mxu2 %vm232_vm1, %v2279_v6  ;;  %v214_v8 = vld [vmem:[%s2273_s7 + $0x1] sm:$0xff]  ;;  %v2299_v11 = vld [vmem:[%s2273_s7 + $0x69] sm:$0xff]  ;;  %s190_s27 = sadd.s32 %s1835_s26, %s3032_s25 }
  0x17   : > { %1853 = vmatmul.msk.f32.vlgmr.msra.gmra.mxu3 %vm232_vm1, %v2282_v7  ;;  %1841 = vmatmul.msk.f32.vlgmr.msra.gmra.mxu0 %vm232_vm1, %v214_v8  ;;  %v2306_v13 = vld [vmem:[%s2273_s7 + $0x99] sm:$0xff]  ;;  %v215_v14 = vld [vmem:[%s2273_s7 + $0x9] sm:$0xff]  ;;  %v2343_v21 = vld [vmem:[%s2273_s7 + $0x51] sm:$0xff]  ;;  %s1836_s12 = sshll.u32 %s190_s27, 3 }
  0x18   : > { %2015 = vmatpush.msk.msra.mxu2 %vm281_vm0, %v2014_v9  ;;  %2049 = vmatpush.msk.msra.mxu3 %vm281_vm0, %v2048_v12  ;;  %v2326_v17 = vld [vmem:[%s2273_s7 + $0x49] sm:$0xff]  ;;  %v2329_v18 = vld [vmem:[%s2273_s7 + $0x79] sm:$0xff]  ;;  %v2346_v22 = vld [vmem:[%s2273_s7 + $0x81] sm:$0xff]  ;;  %s2918_s4 = scalar_lea.vmem %s3009_s3, %s1836_s12 }
  0x19   : > { %1979 = vmatpush.msk.msra.mxu1 %vm281_vm0, %v1978_v15  ;;  %2083 = vmatpush.msk.msra.mxu0 %vm281_vm0, %v2082_v16  ;;  %v2332_v19 = vld [vmem:[%s2273_s7 + $0xa9] sm:$0xff]  ;;  %v216_v20 = vld [vmem:[%s2273_s7 + $0x19] sm:$0xff]  ;;  %v2349_v23 = vld [vmem:[%s2273_s7 + $0xb1] sm:$0xff] }
  0x1a   : > { %v217_v24 = vld [vmem:[%s2273_s7 + $0x21] sm:$0xff]  ;;  %v1894_v27 = vld [vmem:[%s2273_s7 + $0x18] sm:$0xff]  ;;  %v467_v29 = vld [vmem:[%s2273_s7 + $0xa] sm:$0xff] }
  0x1b   : > { %v197_v25 = vld [vmem:[%s2273_s7] sm:$0xff]  ;;  %v198_v28 = vld [vmem:[%s2273_s7 + $0x8] sm:$0xff]  ;;  %v2377_v32 = vld [vmem:[%s2273_s7 + $0x30] sm:$0xff] }
  0x1c   : > { %v466_v26 = vld [vmem:[%s2273_s7 + $0x2] sm:$0xff]  ;;  %v2374_v31 = vld [vmem:[%s2273_s7 + $0x1a] sm:$0xff]  ;;  %v2400_v35 = vld [vmem:[%s2273_s7 + $0x32] sm:$0xff] }
  0x1d   : > { %v1895_v30 = vld [vmem:[%s2273_s7 + $0x20] sm:$0xff]  ;;  %v2390_v34 = vld [vmem:[%s2273_s7 + $0x38] sm:$0xff]  ;;  %v2403_v36 = vld [vmem:[%s2273_s7 + $0x48] sm:$0xff] }
  0x1e   : > { %1846 = vmatmul.msk.f32.gmra.mxu1 %vm232_vm1, %v2296_v10  ;;  %1850 = vmatmul.msk.f32.gmra.mxu2 %vm232_vm1, %v2299_v11  ;;  %v2387_v33 = vld [vmem:[%s2273_s7 + $0x22] sm:$0xff]  ;;  %v2414_v37 = vld [vmem:[%s2273_s7 + $0x3a] sm:$0xff]  ;;  %v2417_v38 = vld [vmem:[%s2273_s7 + $0x50] sm:$0xff] }
  0x1f   : > { %1854 = vmatmul.msk.f32.gmra.mxu3 %vm232_vm1, %v2306_v13  ;;  %1842 = vmatmul.msk.f32.gmra.mxu0 %vm232_vm1, %v215_v14  ;;  %v2428_v39 = vld [vmem:[%s2273_s7 + $0x4a] sm:$0xff]  ;;  %v2431_v40 = vld [vmem:[%s2273_s7 + $0x60] sm:$0xff]  ;;  %v2442_v41 = vld [vmem:[%s2273_s7 + $0x52] sm:$0xff] }
  0x20   : > { %v2445_v42 = vld [vmem:[%s2273_s7 + $0x68] sm:$0xff]  ;;  %v2459_v44 = vld [vmem:[%s2273_s7 + $0x78] sm:$0xff]  ;;  %v2473_v46 = vld [vmem:[%s2273_s7 + $0x80] sm:$0xff] }
  0x21   : > { %v2456_v43 = vld [vmem:[%s2273_s7 + $0x62] sm:$0xff]  ;;  %v2470_v45 = vld [vmem:[%s2273_s7 + $0x6a] sm:$0xff]  ;;  %v2484_v47 = vld [vmem:[%s2273_s7 + $0x7a] sm:$0xff] }
  0x22   : > { %v2487_v48 = vld [vmem:[%s2273_s7 + $0x90] sm:$0xff]  ;;  %v2498_v49 = vld [vmem:[%s2273_s7 + $0x82] sm:$0xff]  ;;  %v2501_v50 = vld [vmem:[%s2273_s7 + $0x98] sm:$0xff] }
  0x23   : > { %v2514_v52 = vld [vmem:[%s2273_s7 + $0x92] sm:$0xff]  ;;  %v2517_v53 = vld [vmem:[%s2273_s7 + $0xa8] sm:$0xff]  ;;  %v2534_v58 = vld [vmem:[%s2273_s7 + $0x9a] sm:$0xff] }
  0x24   : > { %v2537_v59 = vld [vmem:[%s2273_s7 + $0xb0] sm:$0xff]  ;;  %v2557_v1 = vld [vmem:[%s2273_s7 + $0xc0] sm:$0xff]  ;;  %v2580_v14 = vld [vmem:[%s2273_s7 + $0xc8] sm:$0xff] }
  0x25   : > { %v2554_v0 = vld [vmem:[%s2273_s7 + $0xaa] sm:$0xff]  ;;  %v2560_v3 = vld [vmem:[%s2273_s7 + $0xc1] sm:$0xff]  ;;  %v2577_v12 = vld [vmem:[%s2273_s7 + $0xb2] sm:$0xff] }
  0x26   : > { %1847 = vmatmul.msk.f32.gmra.mxu1 %vm232_vm1, %v2326_v17  ;;  %1851 = vmatmul.msk.f32.gmra.mxu2 %vm232_vm1, %v2329_v18  ;;  %v2583_v16 = vld [vmem:[%s2273_s7 + $0xc9] sm:$0xff] }
  0x27   : > { %1855 = vmatmul.msk.f32.gmra.mxu3 %vm232_vm1, %v2332_v19  ;;  %1843 = vmatmul.msk.f32.gmra.mxu0 %vm232_vm1, %v216_v20  ;;  %3013 = vst [vmem:[#allocation4_spill] sm:$0xff] %v2583_v16 }
  0x2e   : > { %1848 = vmatmul.msk.f32.gmra.mxu1 %vm232_vm1, %v2343_v21  ;;  %1852 = vmatmul.msk.f32.gmra.mxu2 %vm232_vm1, %v2346_v22 }
  0x2f   : > { %1856 = vmatmul.msk.f32.gmra.mxu3 %vm232_vm1, %v2349_v23  ;;  %1844 = vmatmul.msk.f32.gmra.mxu0 %vm232_vm1, %v217_v24 }
  0x36   : > { %1858 = vmatmul.msk.f32.vlgmr.msrb.gmra.mxu1 %vm232_vm1, %v197_v25  ;;  %1876 = vmatmul.msk.f32.vlgmr.msrb.gmra.mxu2 %vm232_vm1, %v466_v26 }
  0x37   : > { %1912 = vmatmul.msk.f32.vlgmr.msrb.gmra.mxu3 %vm232_vm1, %v1894_v27  ;;  %1946 = vmatmul.msk.f32.vlgmr.msrb.gmra.mxu0 %vm232_vm1, %v216_v20 }
  0x3e   : > { %1859 = vmatmul.msk.f32.gmra.mxu1 %vm232_vm1, %v198_v28  ;;  %1877 = vmatmul.msk.f32.gmra.mxu2 %vm232_vm1, %v467_v29 }
  0x3f   : > { %1913 = vmatmul.msk.f32.gmra.mxu3 %vm232_vm1, %v1895_v30  ;;  %1947 = vmatmul.msk.f32.gmra.mxu0 %vm232_vm1, %v217_v24 }
  0x46   : > { %1860 = vmatmul.msk.f32.gmra.mxu1 %vm232_vm1, %v1894_v27  ;;  %1878 = vmatmul.msk.f32.gmra.mxu2 %vm232_vm1, %v2374_v31 }
  0x47   : > { %1914 = vmatmul.msk.f32.gmra.mxu3 %vm232_vm1, %v2377_v32  ;;  %1948 = vmatmul.msk.f32.gmra.mxu0 %vm232_vm1, %v2276_v5 }
  0x4e   : > { %1861 = vmatmul.msk.f32.gmra.mxu1 %vm232_vm1, %v1895_v30  ;;  %1879 = vmatmul.msk.f32.gmra.mxu2 %vm232_vm1, %v2387_v33 }
  0x4f   : > { %1915 = vmatmul.msk.f32.gmra.mxu3 %vm232_vm1, %v2390_v34  ;;  %1949 = vmatmul.msk.f32.gmra.mxu0 %vm232_vm1, %v2296_v10 }
  0x56   : > { %1862 = vmatmul.msk.f32.gmra.mxu1 %vm232_vm1, %v2377_v32  ;;  %1880 = vmatmul.msk.f32.gmra.mxu2 %vm232_vm1, %v2400_v35 }
  0x57   : > { %1916 = vmatmul.msk.f32.gmra.mxu3 %vm232_vm1, %v2403_v36  ;;  %1950 = vmatmul.msk.f32.gmra.mxu0 %vm232_vm1, %v2326_v17 }
  0x5e   : > { %1863 = vmatmul.msk.f32.gmra.mxu1 %vm232_vm1, %v2390_v34  ;;  %1881 = vmatmul.msk.f32.gmra.mxu2 %vm232_vm1, %v2414_v37 }
  0x5f   : > { %1917 = vmatmul.msk.f32.gmra.mxu3 %vm232_vm1, %v2417_v38  ;;  %1951 = vmatmul.msk.f32.gmra.mxu0 %vm232_vm1, %v2343_v21 }
  0x66   : > { %1864 = vmatmul.msk.f32.gmra.mxu1 %vm232_vm1, %v2403_v36  ;;  %1882 = vmatmul.msk.f32.gmra.mxu2 %vm232_vm1, %v2428_v39 }
  0x67   : > { %1918 = vmatmul.msk.f32.gmra.mxu3 %vm232_vm1, %v2431_v40  ;;  %1952 = vmatmul.msk.f32.gmra.mxu0 %vm232_vm1, %v2279_v6 }
  0x6e   : > { %1865 = vmatmul.msk.f32.gmra.mxu1 %vm232_vm1, %v2417_v38  ;;  %1883 = vmatmul.msk.f32.gmra.mxu2 %vm232_vm1, %v2442_v41 }
  0x6f   : > { %1919 = vmatmul.msk.f32.gmra.mxu3 %vm232_vm1, %v2445_v42  ;;  %1953 = vmatmul.msk.f32.gmra.mxu0 %vm232_vm1, %v2299_v11 }
  0x76   : > { %1866 = vmatmul.msk.f32.gmra.mxu1 %vm232_vm1, %v2431_v40  ;;  %1884 = vmatmul.msk.f32.gmra.mxu2 %vm232_vm1, %v2456_v43 }
  0x77   : > { %1920 = vmatmul.msk.f32.gmra.mxu3 %vm232_vm1, %v2459_v44  ;;  %1954 = vmatmul.msk.f32.gmra.mxu0 %vm232_vm1, %v2329_v18 }
  0x7e   : > { %1867 = vmatmul.msk.f32.gmra.mxu1 %vm232_vm1, %v2445_v42  ;;  %1885 = vmatmul.msk.f32.gmra.mxu2 %vm232_vm1, %v2470_v45 }
  0x7f   : > { %1921 = vmatmul.msk.f32.gmra.mxu3 %vm232_vm1, %v2473_v46  ;;  %1955 = vmatmul.msk.f32.gmra.mxu0 %vm232_vm1, %v2346_v22 }
  0x86   : > { %1868 = vmatmul.msk.f32.gmra.mxu1 %vm232_vm1, %v2459_v44  ;;  %1886 = vmatmul.msk.f32.gmra.mxu2 %vm232_vm1, %v2484_v47 }
  0x87   : > { %1922 = vmatmul.msk.f32.gmra.mxu3 %vm232_vm1, %v2487_v48  ;;  %1956 = vmatmul.msk.f32.gmra.mxu0 %vm232_vm1, %v2282_v7 }
  0x8e   : > { %1869 = vmatmul.msk.f32.gmra.mxu1 %vm232_vm1, %v2473_v46  ;;  %1887 = vmatmul.msk.f32.gmra.mxu2 %vm232_vm1, %v2498_v49 }
  0x8f   : > { %1923 = vmatmul.msk.f32.gmra.mxu3 %vm232_vm1, %v2501_v50  ;;  %1957 = vmatmul.msk.f32.gmra.mxu0 %vm232_vm1, %v2306_v13 }
  0x93   : > { %v2511_v51 = vpop.f32.mrf.mxu1 }
  0x94   : > { %v302_v54 = vpop.f32.mrf.mxu0 }
  0x96   : > { %1870 = vmatmul.msk.f32.gmra.mxu1 %vm232_vm1, %v2487_v48  ;;  %1888 = vmatmul.msk.f32.gmra.mxu2 %vm232_vm1, %v2514_v52 }
  0x97   : > { %1924 = vmatmul.msk.f32.gmra.mxu3 %vm232_vm1, %v2517_v53  ;;  %1958 = vmatmul.msk.f32.gmra.mxu0 %vm232_vm1, %v2332_v19 }
  0x99   : > { %v2527_v55 = vpop.f32.mrf.mxu2 }
  0x9a   : > { %v2529_v56 = vpop.f32.mrf.mxu3 }
  0x9b   : > { %v2531_v57 = vpop.f32.mrf.mxu1 }
  0x9c   : > { %v305_v60 = vpop.f32.mrf.mxu0 }
  0x9e   : > { %1871 = vmatmul.msk.f32.gmra.mxu1 %vm232_vm1, %v2501_v50  ;;  %1889 = vmatmul.msk.f32.gmra.mxu2 %vm232_vm1, %v2534_v58 }
  0x9f   : > { %1925 = vmatmul.msk.f32.gmra.mxu3 %vm232_vm1, %v2537_v59  ;;  %1959 = vmatmul.msk.f32.gmra.mxu0 %vm232_vm1, %v2349_v23 }
  0xa1   : > { %v2547_v61 = vpop.f32.mrf.mxu2 }
  0xa2   : > { %v2549_v62 = vpop.f32.mrf.mxu3 }
  0xa3   : > { %3011 = vst [vmem:[#allocation2_spill] sm:$0xff] %v2549_v62  ;;  %v2551_v63 = vpop.f32.mrf.mxu1 }
  0xa4   : > { %v308_v2 = vpop.f32.mrf.mxu0 }
  0xa6   : > { %1872 = vmatmul.msk.f32.gmra.mxu1 %vm232_vm1, %v2517_v53  ;;  %1890 = vmatmul.msk.f32.gmra.mxu2 %vm232_vm1, %v2554_v0 }
  0xa7   : > { %1926 = vmatmul.msk.f32.gmra.mxu3 %vm232_vm1, %v2557_v1  ;;  %1960 = vmatmul.msk.f32.gmra.mxu0 %vm232_vm1, %v2560_v3 }
  0xa9   : > { %v2570_v4 = vpop.f32.mrf.mxu2 }
  0xaa   : > { %v2572_v8 = vpop.f32.mrf.mxu3 }
  0xab   : > { %3012 = vst [vmem:[#allocation3_spill] sm:$0xff] %v2572_v8  ;;  %v2574_v9 = vpop.f32.mrf.mxu1 }
  0xac   : > { %v311_v15 = vpop.f32.mrf.mxu0 }
  0xae   : > { %1873 = vmatmul.msk.f32.gmra.mxu1 %vm232_vm1, %v2537_v59  ;;  %1891 = vmatmul.msk.f32.gmra.mxu2 %vm232_vm1, %v2577_v12 }
  0xaf   : > { %1927 = vmatmul.msk.f32.gmra.mxu3 %vm232_vm1, %v2580_v14  ;;  %1961 = vmatmul.msk.f32.gmra.mxu0 %vm232_vm1, %v2583_v16 }
  0xb1   : > { %v2593_v20 = vpop.f32.mrf.mxu2 }
  0xb2   : > { %v2595_v24 = vpop.f32.mrf.mxu3 }
  0xb3   : > { %3014 = vst [vmem:[#allocation5_spill] sm:$0xff] %v2595_v24  ;;  %v418_v25 = vpop.f32.mrf.mxu1 }
  0xb4   : > { %v855_v26 = vpop.f32.mrf.mxu0  ;;  %v419_v27 = vadd.f32 %v418_v25, %v302_v54 }
  0xb6   : > { %1980 = vmatmul.msk.f32.vlgmr.msra.gmra.mxu1 %vm232_vm1, %v2374_v31  ;;  %2016 = vmatmul.msk.f32.vlgmr.msra.gmra.mxu2 %vm232_vm1, %v2377_v32 }
  0xb7   : > { %2050 = vmatmul.msk.f32.vlgmr.msra.gmra.mxu3 %vm232_vm1, %v2276_v5  ;;  %2084 = vmatmul.msk.f32.vlgmr.msra.gmra.mxu0 %vm232_vm1, %v2400_v35 }
  0xb9   : > { %v552_v28 = vpop.f32.mrf.mxu2 }
  0xba   : > { %v600_v29 = vadd.f32 %v552_v28, %v419_v27  ;;  %v705_v30 = vpop.f32.mrf.mxu3 }
  0xbb   : > { %v421_v8 = vpop.f32.mrf.mxu1 }
  0xbc   : > { %v753_v24 = vadd.f32 %v705_v30, %v600_v29  ;;  %v858_v62 = vpop.f32.mrf.mxu0  ;;  %v422_v5 = vadd.f32 %v421_v8, %v305_v60 }
  0xbe   : > { %v2605_v16 = vadd.f32 %v855_v26, %v753_v24  ;;  %1981 = vmatmul.msk.f32.gmra.mxu1 %vm232_vm1, %v2387_v33  ;;  %2017 = vmatmul.msk.f32.gmra.mxu2 %vm232_vm1, %v2390_v34 }
  0xbf   : > { %2051 = vmatmul.msk.f32.gmra.mxu3 %vm232_vm1, %v2296_v10  ;;  %2085 = vmatmul.msk.f32.gmra.mxu0 %vm232_vm1, %v2414_v37 }
  0xc1   : > { %v555_v31 = vpop.f32.mrf.mxu2 }
  0xc2   : > { %v601_v32 = vadd.f32 %v555_v31, %v422_v5  ;;  %v708_v54 = vpop.f32.mrf.mxu3 }
  0xc3   : > { %v424_v25 = vpop.f32.mrf.mxu1 }
  0xc4   : > { %v754_v27 = vadd.f32 %v708_v54, %v601_v32  ;;  %v861_v24 = vpop.f32.mrf.mxu0  ;;  %v425_v10 = vadd.f32 %v424_v25, %v308_v2 }
  0xc6   : > { %v2615_v26 = vadd.f32 %v858_v62, %v754_v27  ;;  %1982 = vmatmul.msk.f32.gmra.mxu1 %vm232_vm1, %v2400_v35  ;;  %2018 = vmatmul.msk.f32.gmra.mxu2 %vm232_vm1, %v2403_v36 }
  0xc7   : > { %2052 = vmatmul.msk.f32.gmra.mxu3 %vm232_vm1, %v2326_v17  ;;  %2086 = vmatmul.msk.f32.gmra.mxu0 %vm232_vm1, %v2428_v39 }
  0xc9   : > { %v558_v33 = vpop.f32.mrf.mxu2 }
  0xca   : > { %v602_v34 = vadd.f32 %v558_v33, %v425_v10  ;;  %v711_v60 = vpop.f32.mrf.mxu3 }
  0xcb   : > { %v427_v8 = vpop.f32.mrf.mxu1 }
  0xcc   : > { %v755_v28 = vadd.f32 %v711_v60, %v602_v34  ;;  %v864_v62 = vpop.f32.mrf.mxu0  ;;  %v428_v17 = vadd.f32 %v427_v8, %v311_v15 }
  0xce   : > { %v2625_v29 = vadd.f32 %v861_v24, %v755_v28  ;;  %1983 = vmatmul.msk.f32.gmra.mxu1 %vm232_vm1, %v2414_v37  ;;  %2019 = vmatmul.msk.f32.gmra.mxu2 %vm232_vm1, %v2417_v38 }
  0xcf   : > { %2053 = vmatmul.msk.f32.gmra.mxu3 %vm232_vm1, %v2343_v21  ;;  %2087 = vmatmul.msk.f32.gmra.mxu0 %vm232_vm1, %v2442_v41 }
  0xd1   : > { %v561_v35 = vpop.f32.mrf.mxu2 }
  0xd2   : > { %v603_v36 = vadd.f32 %v561_v35, %v428_v17  ;;  %v714_v2 = vpop.f32.mrf.mxu3 }
  0xd3   : > { %v430_v30 = vpop.f32.mrf.mxu1 }
  0xd4   : > { %v756_v5 = vadd.f32 %v714_v2, %v603_v36  ;;  %v867_v31 = vpop.f32.mrf.mxu0  ;;  %v431_v21 = vadd.f32 %v430_v30, %v2511_v51 }
  0xd6   : > { %v2635_v32 = vadd.f32 %v864_v62, %v756_v5  ;;  %1984 = vmatmul.msk.f32.gmra.mxu1 %vm232_vm1, %v2428_v39  ;;  %2020 = vmatmul.msk.f32.gmra.mxu2 %vm232_vm1, %v2431_v40 }
  0xd7   : > { %2054 = vmatmul.msk.f32.gmra.mxu3 %vm232_vm1, %v2279_v6  ;;  %2088 = vmatmul.msk.f32.gmra.mxu0 %vm232_vm1, %v2456_v43 }
  0xd9   : > { %v564_v37 = vpop.f32.mrf.mxu2 }
  0xda   : > { %v604_v38 = vadd.f32 %v564_v37, %v431_v21  ;;  %v717_v15 = vpop.f32.mrf.mxu3 }
  0xdb   : > { %v433_v54 = vpop.f32.mrf.mxu1 }
  0xdc   : > { %v757_v25 = vadd.f32 %v717_v15, %v604_v38  ;;  %v870_v27 = vpop.f32.mrf.mxu0  ;;  %v434_v6 = vadd.f32 %v433_v54, %v2531_v57 }
  0xde   : > { %v2646_v24 = vadd.f32 %v867_v31, %v757_v25  ;;  %1985 = vmatmul.msk.f32.gmra.mxu1 %vm232_vm1, %v2442_v41  ;;  %2021 = vmatmul.msk.f32.gmra.mxu2 %vm232_vm1, %v2445_v42 }
  0xdf   : > { %2055 = vmatmul.msk.f32.gmra.mxu3 %vm232_vm1, %v2299_v11  ;;  %2089 = vmatmul.msk.f32.gmra.mxu0 %vm232_vm1, %v2470_v45 }
  0xe1   : > { %v567_v39 = vpop.f32.mrf.mxu2 }
  0xe2   : > { %v605_v40 = vadd.f32 %v567_v39, %v434_v6  ;;  %v720_v51 = vpop.f32.mrf.mxu3 }
  0xe3   : > { %v436_v10 = vpop.f32.mrf.mxu1 }
  0xe4   : > { %v758_v33 = vadd.f32 %v720_v51, %v605_v40  ;;  %v873_v34 = vpop.f32.mrf.mxu0  ;;  %v437_v11 = vadd.f32 %v436_v10, %v2551_v63 }
  0xe6   : > { %v2657_v60 = vadd.f32 %v870_v27, %v758_v33  ;;  %1986 = vmatmul.msk.f32.gmra.mxu1 %vm232_vm1, %v2456_v43  ;;  %2022 = vmatmul.msk.f32.gmra.mxu2 %vm232_vm1, %v2459_v44 }
  0xe7   : > { %2056 = vmatmul.msk.f32.gmra.mxu3 %vm232_vm1, %v2329_v18  ;;  %2090 = vmatmul.msk.f32.gmra.mxu0 %vm232_vm1, %v2484_v47 }
  0xe9   : > { %v570_v41 = vpop.f32.mrf.mxu2 }
  0xea   : > { %v606_v42 = vadd.f32 %v570_v41, %v437_v11  ;;  %v723_v57 = vpop.f32.mrf.mxu3 }
  0xeb   : > { %v439_v8 = vpop.f32.mrf.mxu1 }
  0xec   : > { %v759_v28 = vadd.f32 %v723_v57, %v606_v42  ;;  %v876_v62 = vpop.f32.mrf.mxu0  ;;  %v440_v18 = vadd.f32 %v439_v8, %v2574_v9 }
  0xee   : > { %v2668_v17 = vadd.f32 %v873_v34, %v759_v28  ;;  %1987 = vmatmul.msk.f32.gmra.mxu1 %vm232_vm1, %v2470_v45  ;;  %2023 = vmatmul.msk.f32.gmra.mxu2 %vm232_vm1, %v2473_v46  ;;  %v2078_v34 = vld [vmem:[%s2273_s7 + $0xc2] sm:$0xff] }
  0xef   : > { %2057 = vmatmul.msk.f32.gmra.mxu3 %vm232_vm1, %v2346_v22  ;;  %2091 = vmatmul.msk.f32.gmra.mxu0 %vm232_vm1, %v2498_v49 }
  0xf1   : > { %v573_v43 = vpop.f32.mrf.mxu2 }
  0xf2   : > { %v607_v44 = vadd.f32 %v573_v43, %v440_v18  ;;  %v726_v63 = vpop.f32.mrf.mxu3 }
  0xf3   : > { %v442_v35 = vpop.f32.mrf.mxu1 }
  0xf4   : > { %v760_v36 = vadd.f32 %v726_v63, %v607_v44  ;;  %v879_v2 = vpop.f32.mrf.mxu0  ;;  %v443_v22 = vadd.f32 %v442_v35, %v2527_v55  ;;  %v2012_v44 = vld [vmem:[%s2273_s7 + $0xd8] sm:$0xff] }
  0xf5   : > { %v2046_v35 = vld [vmem:[%s2273_s7 + $0xd9] sm:$0xff] }
  0xf6   : > { %v2679_v30 = vadd.f32 %v876_v62, %v760_v36  ;;  %1988 = vmatmul.msk.f32.gmra.mxu1 %vm232_vm1, %v2484_v47  ;;  %2024 = vmatmul.msk.f32.gmra.mxu2 %vm232_vm1, %v2487_v48  ;;  %v2080_v36 = vld [vmem:[%s2273_s7 + $0xda] sm:$0xff] }
  0xf7   : > { %2058 = vmatmul.msk.f32.gmra.mxu3 %vm232_vm1, %v2282_v7  ;;  %2092 = vmatmul.msk.f32.gmra.mxu0 %vm232_vm1, %v2514_v52 }
  0xf9   : > { %v576_v45 = vpop.f32.mrf.mxu2 }
  0xfa   : > { %v608_v46 = vadd.f32 %v576_v45, %v443_v22  ;;  %v729_v9 = vpop.f32.mrf.mxu3 }
  0xfb   : > { %v445_v5 = vpop.f32.mrf.mxu1 }
  0xfc   : > { %v761_v31 = vadd.f32 %v729_v9, %v608_v46  ;;  %v882_v21 = vpop.f32.mrf.mxu0  ;;  %v446_v7 = vadd.f32 %v445_v5, %v2547_v61 }
  0xfe   : > { %v2690_v37 = vadd.f32 %v879_v2, %v761_v31  ;;  %1989 = vmatmul.msk.f32.gmra.mxu1 %vm232_vm1, %v2498_v49  ;;  %2025 = vmatmul.msk.f32.gmra.mxu2 %vm232_vm1, %v2501_v50  ;;  %v3017_v2 = vld [vmem:[#allocation3_spill] sm:$0xff]  ;;  %v2013_v31 = vld [vmem:[%s2273_s7 + $0xe0] sm:$0xff] }
  0xff   : > { %2059 = vmatmul.msk.f32.gmra.mxu3 %vm232_vm1, %v2306_v13  ;;  %2093 = vmatmul.msk.f32.gmra.mxu0 %vm232_vm1, %v2534_v58 }
 0x101   : > { %v579_v47 = vpop.f32.mrf.mxu2 }
 0x102   : > { %v609_v48 = vadd.f32 %v579_v47, %v446_v7  ;;  %v732_v55 = vpop.f32.mrf.mxu3  ;;  %v2047_v7 = vld [vmem:[%s2273_s7 + $0xe1] sm:$0xff] }
 0x103   : > { %v448_v38 = vpop.f32.mrf.mxu1 }
 0x104   : > { %v762_v15 = vadd.f32 %v732_v55, %v609_v48  ;;  %v885_v54 = vpop.f32.mrf.mxu0  ;;  %v449_v13 = vadd.f32 %v448_v38, %v2570_v4  ;;  %v2081_v48 = vld [vmem:[%s2273_s7 + $0xe2] sm:$0xff]  ;;  %v3018_v38 = vld [vmem:[#allocation5_spill] sm:$0xff] }
 0x106   : > { %v2701_v25 = vadd.f32 %v882_v21, %v762_v15  ;;  %1990 = vmatmul.msk.f32.gmra.mxu1 %vm232_vm1, %v2514_v52  ;;  %2026 = vmatmul.msk.f32.gmra.mxu2 %vm232_vm1, %v2517_v53 }
 0x107   : > { %2060 = vmatmul.msk.f32.gmra.mxu3 %vm232_vm1, %v2332_v19  ;;  %2094 = vmatmul.msk.f32.gmra.mxu0 %vm232_vm1, %v2554_v0 }
 0x109   : > { %v582_v49 = vpop.f32.mrf.mxu2 }
 0x10a   : > { %v610_v50 = vadd.f32 %v582_v49, %v449_v13  ;;  %v735_v61 = vpop.f32.mrf.mxu3 }
 0x10b   : > { %v451_v27 = vpop.f32.mrf.mxu1 }
 0x10c   : > { %v763_v6 = vadd.f32 %v735_v61, %v610_v50  ;;  %v888_v39 = vpop.f32.mrf.mxu0  ;;  %v452_v19 = vadd.f32 %v451_v27, %v2593_v20 }
 0x10e   : > { %v2712_v40 = vadd.f32 %v885_v54, %v763_v6  ;;  %1991 = vmatmul.msk.f32.gmra.mxu1 %vm232_vm1, %v2534_v58  ;;  %2027 = vmatmul.msk.f32.gmra.mxu2 %vm232_vm1, %v2537_v59 }
 0x10f   : > { %2061 = vmatmul.msk.f32.gmra.mxu3 %vm232_vm1, %v2349_v23  ;;  %2095 = vmatmul.msk.f32.gmra.mxu0 %vm232_vm1, %v2577_v12 }
 0x111   : > { %v585_v52 = vpop.f32.mrf.mxu2 }
 0x112   : > { %v611_v53 = vadd.f32 %v585_v52, %v452_v19  ;;  %v738_v4 = vpop.f32.mrf.mxu3 }
 0x113   : > { %v454_v51 = vpop.f32.mrf.mxu1 }
 0x114   : > { %v764_v10 = vadd.f32 %v738_v4, %v611_v53  ;;  %v891_v33 = vpop.f32.mrf.mxu0  ;;  %v455_v23 = vadd.f32 %v454_v51, %v2529_v56  ;;  %v3016_v56 = vld [vmem:[#allocation2_spill] sm:$0xff] }
 0x116   : > { %v2724_v58 = vadd.f32 %v888_v39, %v764_v10  ;;  %1992 = vmatmul.msk.f32.gmra.mxu1 %vm232_vm1, %v2554_v0  ;;  %2028 = vmatmul.msk.f32.gmra.mxu2 %vm232_vm1, %v2557_v1  ;;  %v2079_v0 = vld [vmem:[%s2273_s7 + $0xca] sm:$0xff] }
 0x117   : > { %2062 = vmatmul.msk.f32.gmra.mxu3 %vm232_vm1, %v2560_v3  ;;  %2096 = vmatmul.msk.f32.gmra.mxu0 %vm232_vm1, %v2078_v34  ;;  %v3015_v1 = vld [vmem:[#allocation4_spill] sm:$0xff] }
 0x119   : > { %v588_v59 = vpop.f32.mrf.mxu2 }
 0x11a   : > { %v612_v20 = vadd.f32 %v588_v59, %v455_v23  ;;  %v741_v11 = vpop.f32.mrf.mxu3 }
 0x11b   : > { %v457_v41 = vpop.f32.mrf.mxu1 }
 0x11c   : > { %v765_v42 = vadd.f32 %v741_v11, %v612_v20  ;;  %v894_v57 = vpop.f32.mrf.mxu0  ;;  %v458_v3 = vadd.f32 %v457_v41, %v3016_v56 }
 0x11e   : > { %v2735_v8 = vadd.f32 %v891_v33, %v765_v42  ;;  %1993 = vmatmul.msk.f32.gmra.mxu1 %vm232_vm1, %v2577_v12  ;;  %2029 = vmatmul.msk.f32.gmra.mxu2 %vm232_vm1, %v2580_v14 }
 0x11f   : > { %2063 = vmatmul.msk.f32.gmra.mxu3 %vm232_vm1, %v3015_v1  ;;  %2097 = vmatmul.msk.f32.gmra.mxu0 %vm232_vm1, %v2079_v0 }
 0x121   : > { %v591_v28 = vpop.f32.mrf.mxu2 }
 0x122   : > { %v613_v62 = vadd.f32 %v591_v28, %v458_v3  ;;  %v744_v18 = vpop.f32.mrf.mxu3 }
 0x123   : > { %v460_v43 = vpop.f32.mrf.mxu1 }
 0x124   : > { %v766_v63 = vadd.f32 %v744_v18, %v613_v62  ;;  %v897_v12 = vpop.f32.mrf.mxu0  ;;  %v461_v22 = vadd.f32 %v460_v43, %v3017_v2 }
 0x126   : > { %v2748_v14 = vadd.f32 %v894_v57, %v766_v63  ;;  %1994 = vmatmul.msk.f32.gmra.mxu1 %vm232_vm1, %v2078_v34  ;;  %2030 = vmatmul.msk.f32.gmra.mxu2 %vm232_vm1, %v2012_v44 }
 0x127   : > { %2064 = vmatmul.msk.f32.gmra.mxu3 %vm232_vm1, %v2046_v35  ;;  %2098 = vmatmul.msk.f32.gmra.mxu0 %vm232_vm1, %v2080_v36 }
 0x129   : > { %v594_v45 = vpop.f32.mrf.mxu2 }
 0x12a   : > { %v614_v46 = vadd.f32 %v594_v45, %v461_v22  ;;  %v747_v9 = vpop.f32.mrf.mxu3 }
 0x12b   : > { %v463_v5 = vpop.f32.mrf.mxu1 }
 0x12c   : > { %v767_v21 = vadd.f32 %v747_v9, %v614_v46  ;;  %v900_v47 = vpop.f32.mrf.mxu0  ;;  %v464_v15 = vadd.f32 %v463_v5, %v3018_v38 }
 0x12e   : > { %v2758_v55 = vadd.f32 %v897_v12, %v767_v21  ;;  %1995 = vmatmul.msk.f32.gmra.mxu1 %vm232_vm1, %v2079_v0  ;;  %2031 = vmatmul.msk.f32.gmra.mxu2 %vm232_vm1, %v2013_v31 }
 0x12f   : > { %2065 = vmatmul.msk.f32.gmra.mxu3 %vm232_vm1, %v2047_v7  ;;  %2099 = vmatmul.msk.f32.gmra.mxu0 %vm232_vm1, %v2081_v48 }
 0x131   : > { %v597_v54 = vpop.f32.mrf.mxu2 }
 0x132   : > { %v615_v13 = vadd.f32 %v597_v54, %v464_v15  ;;  %v750_v49 = vpop.f32.mrf.mxu3 }
 0x133   : > { %v1005_v50 = vpop.f32.mrf.mxu1 }
 0x134   : > { %v768_v61 = vadd.f32 %v750_v49, %v615_v13  ;;  %v1458_v27 = vpop.f32.mrf.mxu0  ;;  %v1053_v39 = vadd.f32 %v1005_v50, %v2605_v16 }
 0x136   : > { %v2765_v6 = vadd.f32 %v900_v47, %v768_v61 }
 0x139   : > { %v1158_v19 = vpop.f32.mrf.mxu2 }
 0x13a   : > { %v1206_v52 = vadd.f32 %v1158_v19, %v1053_v39  ;;  %v1308_v53 = vpop.f32.mrf.mxu3 }
 0x13b   : > { %v1008_v4 = vpop.f32.mrf.mxu1 }
 0x13c   : > { %v1356_v51 = vadd.f32 %v1308_v53, %v1206_v52  ;;  %v1461_v10 = vpop.f32.mrf.mxu0  ;;  %v1054_v34 = vadd.f32 %v1008_v4, %v2615_v26 }
 0x13e   : > { %v2768_v33 = vadd.f32 %v1458_v27, %v1356_v51 }
 0x140   : > { %1538 = vrot.lane.b32.xlu0 %v2768_v33, %s2189_s23 }
 0x141   : > { %v1161_v23 = vpop.f32.mrf.mxu2 }
 0x142   : > { %v1207_v59 = vadd.f32 %v1161_v23, %v1054_v34  ;;  %v1311_v20 = vpop.f32.mrf.mxu3 }
 0x143   : > { %v1011_v11 = vpop.f32.mrf.mxu1 }
 0x144   : > { %v1357_v41 = vadd.f32 %v1311_v20, %v1207_v59  ;;  %v1464_v16 = vpop.f32.mrf.mxu0  ;;  %v1055_v57 = vadd.f32 %v1011_v11, %v2625_v29 }
 0x146   : > { %v2773_v42 = vadd.f32 %v1461_v10, %v1357_v41 }
 0x148   : > { %1540 = vrot.lane.b32.xlu0 %v2773_v42, %s2189_s23 }
 0x149   : > { %v1164_v0 = vpop.f32.mrf.mxu2 }
 0x14a   : > { %v1208_v1 = vadd.f32 %v1164_v0, %v1055_v57  ;;  %v1314_v26 = vpop.f32.mrf.mxu3 }
 0x14b   : > { %v1014_v56 = vpop.f32.mrf.mxu1 }
 0x14c   : > { %v1358_v3 = vadd.f32 %v1314_v26, %v1208_v1  ;;  %v1467_v28 = vpop.f32.mrf.mxu0  ;;  %v1056_v18 = vadd.f32 %v1014_v56, %v2635_v32 }
 0x14e   : > { %v2778_v62 = vadd.f32 %v1464_v16, %v1358_v3 }
 0x150   : > { %1542 = vrot.lane.b32.xlu1 %v2778_v62, %s2189_s23 }
 0x151   : > { %v1167_v43 = vpop.f32.mrf.mxu2 }
 0x152   : > { %v1209_v44 = vadd.f32 %v1167_v43, %v1056_v18  ;;  %v1317_v63 = vpop.f32.mrf.mxu3 }
 0x153   : > { %v1017_v29 = vpop.f32.mrf.mxu1 }
 0x154   : > { %v1359_v35 = vadd.f32 %v1317_v63, %v1209_v44  ;;  %v1470_v12 = vpop.f32.mrf.mxu0  ;;  %v1057_v2 = vadd.f32 %v1017_v29, %v2646_v24 }
 0x156   : > { %v2783_v36 = vadd.f32 %v1467_v28, %v1359_v35 }
 0x158   : > { %1544 = vrot.lane.b32.xlu1 %v2783_v36, %s2189_s23 }
 0x159   : > { %v1170_v22 = vpop.f32.mrf.mxu2 }
 0x15a   : > { %v1210_v45 = vadd.f32 %v1170_v22, %v1057_v2  ;;  %v1320_v46 = vpop.f32.mrf.mxu3 }
 0x15b   : > { %v1020_v32 = vpop.f32.mrf.mxu1 }
 0x15c   : > { %v1360_v9 = vadd.f32 %v1320_v46, %v1210_v45  ;;  %v1473_v5 = vpop.f32.mrf.mxu0  ;;  %v1058_v21 = vadd.f32 %v1020_v32, %v2657_v60 }
 0x15e   : > { %v2788_v31 = vadd.f32 %v1470_v12, %v1360_v9 }
 0x160   : > { %1546 = vrot.lane.b32.xlu2 %v2788_v31, %s2189_s23 }
 0x161   : > { %v1173_v7 = vpop.f32.mrf.mxu2 }
 0x162   : > { %v1211_v47 = vadd.f32 %v1173_v7, %v1058_v21  ;;  %v1323_v48 = vpop.f32.mrf.mxu3 }
 0x163   : > { %v1023_v24 = vpop.f32.mrf.mxu1 }
 0x164   : > { %v1361_v38 = vadd.f32 %v1323_v48, %v1211_v47  ;;  %v1476_v15 = vpop.f32.mrf.mxu0  ;;  %v1059_v13 = vadd.f32 %v1023_v24, %v2668_v17 }
 0x166   : > { %v2793_v54 = vadd.f32 %v1473_v5, %v1361_v38 }
 0x168   : > { %1548 = vrot.lane.b32.xlu2 %v2793_v54, %s2189_s23 }
 0x169   : > { %v1176_v49 = vpop.f32.mrf.mxu2 }
 0x16a   : > { %v1212_v50 = vadd.f32 %v1176_v49, %v1059_v13  ;;  %v1326_v61 = vpop.f32.mrf.mxu3 }
 0x16b   : > { %v1026_v60 = vpop.f32.mrf.mxu1 }
 0x16c   : > { %v1362_v27 = vadd.f32 %v1326_v61, %v1212_v50  ;;  %v1479_v39 = vpop.f32.mrf.mxu0  ;;  %v1060_v52 = vadd.f32 %v1026_v60, %v2679_v30 }
 0x16e   : > { %v2798_v19 = vadd.f32 %v1476_v15, %v1362_v27 }
 0x170   : > { %1550 = vrot.lane.b32.xlu0 %v2798_v19, %s2189_s23 }
 0x171   : > { %v1179_v53 = vpop.f32.mrf.mxu2 }
 0x172   : > { %v1213_v4 = vadd.f32 %v1179_v53, %v1060_v52  ;;  %v1329_v51 = vpop.f32.mrf.mxu3 }
 0x173   : > { %v1029_v17 = vpop.f32.mrf.mxu1 }
 0x174   : > { %v1363_v10 = vadd.f32 %v1329_v51, %v1213_v4  ;;  %v1482_v34 = vpop.f32.mrf.mxu0  ;;  %v1061_v59 = vadd.f32 %v1029_v17, %v2690_v37 }
 0x176   : > { %v2803_v23 = vadd.f32 %v1479_v39, %v1363_v10 }
 0x178   : > { %1552 = vrot.lane.b32.xlu1 %v2803_v23, %s2189_s23 }
 0x179   : > { %v1182_v20 = vpop.f32.mrf.mxu2 }
 0x17a   : > { %v1214_v11 = vadd.f32 %v1182_v20, %v1061_v59  ;;  %v1332_v41 = vpop.f32.mrf.mxu3 }
 0x17b   : > { %v1032_v30 = vpop.f32.mrf.mxu1 }
 0x17c   : > { %v1364_v16 = vadd.f32 %v1332_v41, %v1214_v11  ;;  %v1485_v57 = vpop.f32.mrf.mxu0  ;;  %v1062_v1 = vadd.f32 %v1032_v30, %v2701_v25 }
 0x17e   : > { %v2808_v0 = vadd.f32 %v1482_v34, %v1364_v16 }
 0x180   : > { %1554 = vrot.lane.b32.xlu2 %v2808_v0, %s2189_s23 }
 0x181   : > { %v1185_v26 = vpop.f32.mrf.mxu2 }
 0x182   : > { %v1215_v56 = vadd.f32 %v1185_v26, %v1062_v1  ;;  %v1335_v3 = vpop.f32.mrf.mxu3 }
 0x183   : > { %v1035_v37 = vpop.f32.mrf.mxu1 }
 0x184   : > { %v1365_v28 = vadd.f32 %v1335_v3, %v1215_v56  ;;  %v1488_v18 = vpop.f32.mrf.mxu0  ;;  %v1063_v44 = vadd.f32 %v1035_v37, %v2712_v40 }
 0x186   : > { %v2813_v43 = vadd.f32 %v1485_v57, %v1365_v28 }
 0x188   : > { %1556 = vrot.lane.b32.xlu0 %v2813_v43, %s2189_s23 }
 0x189   : > { %v1188_v63 = vpop.f32.mrf.mxu2 }
 0x18a   : > { %v1216_v29 = vadd.f32 %v1188_v63, %v1063_v44  ;;  %v1338_v35 = vpop.f32.mrf.mxu3 }
 0x18b   : > { %v1038_v25 = vpop.f32.mrf.mxu1 }
 0x18c   : > { %v1366_v12 = vadd.f32 %v1338_v35, %v1216_v29  ;;  %v1491_v2 = vpop.f32.mrf.mxu0  ;;  %v1064_v45 = vadd.f32 %v1038_v25, %v2724_v58 }
 0x18e   : > { %v2818_v22 = vadd.f32 %v1488_v18, %v1366_v12 }
 0x190   : > { %1558 = vrot.lane.b32.xlu1 %v2818_v22, %s2189_s23 }
 0x191   : > { %v1191_v46 = vpop.f32.mrf.mxu2 }
 0x192   : > { %v1217_v32 = vadd.f32 %v1191_v46, %v1064_v45  ;;  %v1341_v9 = vpop.f32.mrf.mxu3 }
 0x193   : > { %v1041_v40 = vpop.f32.mrf.mxu1 }
 0x194   : > { %v1367_v5 = vadd.f32 %v1341_v9, %v1217_v32  ;;  %v1494_v21 = vpop.f32.mrf.mxu0  ;;  %v1065_v47 = vadd.f32 %v1041_v40, %v2735_v8 }
 0x196   : > { %v2823_v7 = vadd.f32 %v1491_v2, %v1367_v5 }
 0x198   : > { %1560 = vrot.lane.b32.xlu2 %v2823_v7, %s2189_s23 }
 0x199   : > { %v1194_v48 = vpop.f32.mrf.mxu2 }
 0x19a   : > { %v1218_v24 = vadd.f32 %v1194_v48, %v1065_v47  ;;  %v1344_v38 = vpop.f32.mrf.mxu3 }
 0x19b   : > { %v1044_v58 = vpop.f32.mrf.mxu1 }
 0x19c   : > { %v1368_v15 = vadd.f32 %v1344_v38, %v1218_v24  ;;  %v1497_v49 = vpop.f32.mrf.mxu0  ;;  %v1066_v50 = vadd.f32 %v1044_v58, %v2748_v14 }
 0x19e   : > { %v2828_v13 = vadd.f32 %v1494_v21, %v1368_v15 }
 0x1a0   : > { %1562 = vrot.lane.b32.xlu0 %v2828_v13, %s2189_s23 }
 0x1a1   : > { %v1197_v61 = vpop.f32.mrf.mxu2 }
 0x1a2   : > { %v1219_v60 = vadd.f32 %v1197_v61, %v1066_v50  ;;  %v1347_v27 = vpop.f32.mrf.mxu3 }
 0x1a3   : > { %v1047_v8 = vpop.f32.mrf.mxu1 }
 0x1a4   : > { %v1369_v39 = vadd.f32 %v1347_v27, %v1219_v60  ;;  %v1067_v53 = vadd.f32 %v1047_v8, %v2758_v55  ;;  %v1500_v51 = vpop.f32.mrf.mxu0 }
 0x1a6   : > { %v2833_v52 = vadd.f32 %v1497_v49, %v1369_v39 }
 0x1a8   : > { %1564 = vrot.lane.b32.xlu1 %v2833_v52, %s2189_s23 }
 0x1a9   : > { %v1200_v4 = vpop.f32.mrf.mxu2 }
 0x1aa   : > { %v1220_v17 = vadd.f32 %v1200_v4, %v1067_v53  ;;  %v1350_v10 = vpop.f32.mrf.mxu3 }
 0x1ab   : > { %v1050_v34 = vpop.f32.mrf.mxu1 }
 0x1ac   : > { %v1370_v14 = vadd.f32 %v1350_v10, %v1220_v17  ;;  %v1068_v20 = vadd.f32 %v1050_v34, %v2765_v6  ;;  %v1503_v57 = vpop.f32.mrf.mxu0 }
 0x1ae   : > { %v1520_v59 = vadd.f32 %v1500_v51, %v1370_v14 }
 0x1b0   : > { %1566 = vrot.lane.b32.xlu2 %v1520_v59, %s2189_s23 }
 0x1b1   : > { %v1203_v11 = vpop.f32.mrf.mxu2 }
 0x1b2   : > { %v1221_v41 = vadd.f32 %v1203_v11, %v1068_v20  ;;  %v1539_v30 = vpop.permute.xlu0 %1538  ;;  %v1353_v16 = vpop.f32.mrf.mxu3 }
 0x1b3   : > { %v2841_v55 = vmax.f32 %v2768_v33, %v1539_v30 }
 0x1b4   : > { %v1371_v1 = vadd.f32 %v1353_v16, %v1221_v41 }
 0x1b5   : > { %1618 = vrot.lane.b32.xlu1 %v2841_v55, %s2190_s24 }
 0x1b6   : > { %v2845_v26 = vadd.f32 %v1503_v57, %v1371_v1 }
 0x1b8   : > { %1568 = vrot.lane.b32.xlu0 %v2845_v26, %s2189_s23 }
 0x1ba   : > { %v1541_v6 = vpop.permute.xlu0 %1540  ;;  %v1547_v3 = vpop.permute.xlu2 %1546 }
 0x1bb   : > { %v1587_v56 = vmax.f32 %v2773_v42, %v1541_v6  ;;  %v1590_v33 = vmax.f32 %v2788_v31, %v1547_v3 }
 0x1bd   : > { %1620 = vrot.lane.b32.xlu2 %v1587_v56, %s2190_s24 }
 0x1c2   : > { %v1543_v37 = vpop.permute.xlu1 %1542  ;;  %v1549_v18 = vpop.permute.xlu2 %1548 }
 0x1c3   : > { %v2853_v28 = vmax.f32 %v2778_v62, %v1543_v37  ;;  %v2859_v63 = vmax.f32 %v2793_v54, %v1549_v18 }
 0x1c5   : > { %1622 = vrot.lane.b32.xlu0 %v2853_v28, %s2190_s24  ;;  %1626 = vrot.lane.b32.xlu2 %v1590_v33, %s2190_s24 }
 0x1ca   : > { %v1545_v44 = vpop.permute.xlu1 %1544 }
 0x1cb   : > { %v2862_v42 = vmax.f32 %v2783_v36, %v1545_v44 }
 0x1cd   : > { %1628 = vrot.lane.b32.xlu0 %v2859_v63, %s2190_s24  ;;  %1624 = vrot.lane.b32.xlu1 %v2862_v42, %s2190_s24 }
 0x1da   : > { %v1555_v62 = vpop.permute.xlu2 %1554 }
 0x1db   : > { %v2869_v31 = vmax.f32 %v2808_v0, %v1555_v62 }
 0x1dd   : > { %1634 = vrot.lane.b32.xlu0 %v2869_v31, %s2190_s24 }
 0x1e2   : > { %v1551_v29 = vpop.permute.xlu0 %1550 }
 0x1e3   : > { %v2874_v54 = vmax.f32 %v2798_v19, %v1551_v29 }
 0x1e5   : > { %1630 = vrot.lane.b32.xlu1 %v2874_v54, %s2190_s24 }
 0x1ea   : > { %v1553_v36 = vpop.permute.xlu1 %1552 }
 0x1eb   : > { %v2879_v35 = vmax.f32 %v2803_v23, %v1553_v36 }
 0x1ed   : > { %1632 = vrot.lane.b32.xlu2 %v2879_v35, %s2190_s24 }
 0x1f2   : > { %v1561_v0 = vpop.permute.xlu2 %1560 }
 0x1f3   : > { %v2884_v25 = vmax.f32 %v2823_v7, %v1561_v0 }
 0x1f5   : > { %1640 = vrot.lane.b32.xlu0 %v2884_v25, %s2190_s24 }
 0x1fa   : > { %v1557_v19 = vpop.permute.xlu0 %1556 }
 0x1fb   : > { %v2889_v12 = vmax.f32 %v2813_v43, %v1557_v19 }
 0x1fd   : > { %1636 = vrot.lane.b32.xlu1 %v2889_v12, %s2190_s24 }
 0x202   : > { %v1559_v23 = vpop.permute.xlu1 %1558 }
 0x203   : > { %v2894_v2 = vmax.f32 %v2818_v22, %v1559_v23  ;;  %v2912_v22 = vld [vmem:[%s3008_s2] ss:$0 sm:$0xff] }
 0x205   : > { %1638 = vrot.lane.b32.xlu2 %v2894_v2, %s2190_s24 }
 0x20a   : > { %v1567_v45 = vpop.permute.xlu2 %1566 }
 0x20b   : > { %v2899_v46 = vmax.f32 %v1520_v59, %v1567_v45 }
 0x20d   : > { %1646 = vrot.lane.b32.xlu0 %v2899_v46, %s2190_s24 }
 0x212   : > { %v1563_v43 = vpop.permute.xlu0 %1562 }
 0x213   : > { %v2905_v32 = vmax.f32 %v2828_v13, %v1563_v43 }
 0x215   : > { %1642 = vrot.lane.b32.xlu1 %v2905_v32, %s2190_s24 }
 0x217   : > { %v1621_v9 = vpop.permute.xlu2 %1620 }
 0x218   : > { %v1667_v40 = vmax.f32 %v1587_v56, %v1621_v9 }
 0x21a   : > { %v1687_v5 = vadd.f32 %v2912_v22, %v1667_v40  ;;  %v1565_v21 = vpop.permute.xlu1 %1564 }
 0x21b   : > { %v2921_v7 = vmax.f32 %v2833_v52, %v1565_v21 }
 0x21c   : > { %v1703_v47 = vmax.f32 %v1687_v5, 0.0 }
 0x21d   : > { %1644 = vrot.lane.b32.xlu2 %v2921_v7, %s2190_s24 }
 0x21e   : > { %1719 = vst.msk [vmem:[%s2918_s4 + $0x8] sm:$0xff] %vm232_vm1, %v1703_v47 }
 0x21f   : > { %v1627_v48 = vpop.permute.xlu2 %1626 }
 0x220   : > { %v1670_v24 = vmax.f32 %v1590_v33, %v1627_v48 }
 0x222   : > { %v1690_v38 = vadd.f32 %v2912_v22, %v1670_v24 }
 0x224   : > { %v1706_v58 = vmax.f32 %v1690_v38, 0.0 }
 0x226   : > { %1722 = vst.msk [vmem:[%s2918_s4 + $0x20] sm:$0xff] %vm232_vm1, %v1706_v58 }
 0x227   : > { %v1619_v15 = vpop.permute.xlu1 %1618 }
 0x228   : > { %v1666_v13 = vmax.f32 %v2841_v55, %v1619_v15 }
 0x22a   : > { %v1686_v49 = vadd.f32 %v2912_v22, %v1666_v13  ;;  %v1569_v50 = vpop.permute.xlu0 %1568 }
 0x22b   : > { %v2933_v61 = vmax.f32 %v2845_v26, %v1569_v50 }
 0x22c   : > { %v1702_v60 = vmax.f32 %v1686_v49, 0.0 }
 0x22d   : > { %1648 = vrot.lane.b32.xlu1 %v2933_v61, %s2190_s24 }
 0x22e   : > { %1718 = vst.msk [vmem:[%s2918_s4] sm:$0xff] %vm232_vm1, %v1702_v60 }
 0x237   : > { %v1623_v27 = vpop.permute.xlu0 %1622 }
 0x238   : > { %v1668_v8 = vmax.f32 %v2853_v28, %v1623_v27 }
 0x23a   : > { %v1688_v39 = vadd.f32 %v2912_v22, %v1668_v8 }
 0x23c   : > { %v1704_v52 = vmax.f32 %v1688_v39, 0.0 }
 0x23e   : > { %1720 = vst.msk [vmem:[%s2918_s4 + $0x10] sm:$0xff] %vm232_vm1, %v1704_v52 }
 0x23f   : > { %v1625_v53 = vpop.permute.xlu1 %1624  ;;  %v1629_v4 = vpop.permute.xlu0 %1628 }
 0x240   : > { %v1669_v51 = vmax.f32 %v2862_v42, %v1625_v53  ;;  %v1671_v17 = vmax.f32 %v2859_v63, %v1629_v4 }
 0x242   : > { %v1689_v10 = vadd.f32 %v2912_v22, %v1669_v51  ;;  %v1691_v14 = vadd.f32 %v2912_v22, %v1671_v17 }
 0x244   : > { %v1705_v34 = vmax.f32 %v1689_v10, 0.0  ;;  %v1707_v59 = vmax.f32 %v1691_v14, 0.0 }
 0x246   : > { %1721 = vst.msk [vmem:[%s2918_s4 + $0x18] sm:$0xff] %vm232_vm1, %v1705_v34 }
 0x247   : > { %1723 = vst.msk [vmem:[%s2918_s4 + $0x28] sm:$0xff] %vm232_vm1, %v1707_v59  ;;  %v1633_v20 = vpop.permute.xlu2 %1632 }
 0x248   : > { %v1673_v11 = vmax.f32 %v2879_v35, %v1633_v20 }
 0x24a   : > { %v1693_v41 = vadd.f32 %v2912_v22, %v1673_v11 }
 0x24c   : > { %v1709_v30 = vmax.f32 %v1693_v41, 0.0 }
 0x24e   : > { %1725 = vst.msk [vmem:[%s2918_s4 + $0x38] sm:$0xff] %vm232_vm1, %v1709_v30 }
 0x24f   : > { %v1635_v16 = vpop.permute.xlu0 %1634 }
 0x250   : > { %v1674_v55 = vmax.f32 %v2869_v31, %v1635_v16 }
 0x252   : > { %v1694_v57 = vadd.f32 %v2912_v22, %v1674_v55 }
 0x254   : > { %v1710_v1 = vmax.f32 %v1694_v57, 0.0 }
 0x256   : > { %1726 = vst.msk [vmem:[%s2918_s4 + $0x40] sm:$0xff] %vm232_vm1, %v1710_v1 }
 0x257   : > { %v1631_v26 = vpop.permute.xlu1 %1630 }
 0x258   : > { %v1672_v6 = vmax.f32 %v2874_v54, %v1631_v26 }
 0x25a   : > { %v1692_v56 = vadd.f32 %v2912_v22, %v1672_v6 }
 0x25c   : > { %v1708_v3 = vmax.f32 %v1692_v56, 0.0 }
 0x25e   : > { %1724 = vst.msk [vmem:[%s2918_s4 + $0x30] sm:$0xff] %vm232_vm1, %v1708_v3 }
 0x25f   : > { %v1639_v37 = vpop.permute.xlu2 %1638 }
 0x260   : > { %v1676_v33 = vmax.f32 %v2894_v2, %v1639_v37 }
 0x262   : > { %v1696_v28 = vadd.f32 %v2912_v22, %v1676_v33 }
 0x264   : > { %v1712_v18 = vmax.f32 %v1696_v28, 0.0 }
 0x266   : > { %1728 = vst.msk [vmem:[%s2918_s4 + $0x50] sm:$0xff] %vm232_vm1, %v1712_v18 }
 0x267   : > { %v1641_v44 = vpop.permute.xlu0 %1640 }
 0x268   : > { %v1677_v63 = vmax.f32 %v2884_v25, %v1641_v44 }
 0x26a   : > { %v1697_v42 = vadd.f32 %v2912_v22, %v1677_v63 }
 0x26c   : > { %v1713_v62 = vmax.f32 %v1697_v42, 0.0 }
 0x26e   : > { %1729 = vst.msk [vmem:[%s2918_s4 + $0x58] sm:$0xff] %vm232_vm1, %v1713_v62 }
 0x26f   : > { %v1637_v31 = vpop.permute.xlu1 %1636 }
 0x270   : > { %v1675_v29 = vmax.f32 %v2889_v12, %v1637_v31 }
 0x272   : > { %v1695_v54 = vadd.f32 %v2912_v22, %v1675_v29 }
 0x274   : > { %v1711_v36 = vmax.f32 %v1695_v54, 0.0 }
 0x276   : > { %1727 = vst.msk [vmem:[%s2918_s4 + $0x48] sm:$0xff] %vm232_vm1, %v1711_v36 }
 0x277   : > { %v1645_v35 = vpop.permute.xlu2 %1644 }
 0x278   : > { %v1679_v0 = vmax.f32 %v2921_v7, %v1645_v35 }
 0x27a   : > { %v1699_v25 = vadd.f32 %v2912_v22, %v1679_v0 }
 0x27c   : > { %v1715_v19 = vmax.f32 %v1699_v25, 0.0 }
 0x27e   : > { %1731 = vst.msk [vmem:[%s2918_s4 + $0x68] sm:$0xff] %vm232_vm1, %v1715_v19 }
 0x27f   : > { %v1647_v23 = vpop.permute.xlu0 %1646 }
 0x280   : > { %v1680_v2 = vmax.f32 %v2899_v46, %v1647_v23 }
 0x282   : > { %v1700_v12 = vadd.f32 %v2912_v22, %v1680_v2 }
 0x284   : > { %v1716_v45 = vmax.f32 %v1700_v12, 0.0 }
 0x286   : > { %1732 = vst.msk [vmem:[%s2918_s4 + $0x70] sm:$0xff] %vm232_vm1, %v1716_v45 }
 0x287   : > { %v1643_v43 = vpop.permute.xlu1 %1642 }
 0x288   : > { %v1678_v9 = vmax.f32 %v2905_v32, %v1643_v43 }
 0x28a   : > { %v1698_v40 = vadd.f32 %v2912_v22, %v1678_v9 }
 0x28c   : > { %v1714_v5 = vmax.f32 %v1698_v40, 0.0 }
 0x28e   : > { %1730 = vst.msk [vmem:[%s2918_s4 + $0x60] sm:$0xff] %vm232_vm1, %v1714_v5 }
 0x29f   : > { %v1649_v21 = vpop.permute.xlu1 %1648 }
 0x2a0   : > { %v1681_v7 = vmax.f32 %v2933_v61, %v1649_v21 }
 0x2a2   : > { %v1701_v47 = vadd.f32 %v2912_v22, %v1681_v7 }
 0x2a4   : > { %v1717_v48 = vmax.f32 %v1701_v47, 0.0 }
 0x2a6   : > { %1733 = vst.msk [vmem:[%s2918_s4 + $0x78] sm:$0xff] %vm232_vm1, %v1717_v48 }
 0x2a7 PF: > { %s13_s16 = sadd.s32 1, %s2187_s16   ;;  %s3019_s12 = smov %s2179_s14 }
 0x2a8   : > { %p10_p7 = scmp.ge.s32.totalorder %s13_s16, 6   ;;  %s3020_s13 = smov %s2183_s15 }
 0x2a9   : > { %s3021_s14 = smov %s3024_s17  ;;  %s3022_s15 = smov %s3028_s18 }
 0x2aa   :  { %12 = sbr.rel (!%p10_p7) target bundleno = 3 (0x3), region = 73 }

</bundles_post_ra>
